<compile_context>
chip_gen: v7x
topology: tpu7x:2x2x1
jax: 0.10.0
libtpu: 0.0.40
codegen_flags: <defaults>
</compile_context>

<pallas_src>
import functools

import jax
import jax.numpy as jnp
from jax.experimental import pallas as pl
from jax.experimental.pallas import tpu as pltpu


def _round_up(x, m):
    return ((x + m - 1) // m) * m


def _cdiv(a, b):
    return (a + b - 1) // b


def _policy_mlp_kernel(x_ref, w1_ref, b1_ref, w2_ref, b2_ref, o_ref):
    # x_ref : [F, TB]   one batch tile, batch on the 128-lane axis
    # w1_ref: [H, F]    b1_ref: [H, 1]    (PyTorch nn.Linear layout)
    # w2_ref: [A, H]    b2_ref: [A, 1]
    # o_ref : [A, TB]   softmax probs, lane-dense store
    x = x_ref[...]

    # ---- Layer 1: Linear(4 -> H) + ReLU on the MXU, bias folded into the add.
    h = jnp.maximum(
        jnp.dot(w1_ref[...], x, preferred_element_type=jnp.float32) + b1_ref[...],
        0.0,
    )

    # ---- Layer 2: Linear(H -> A) on the MXU, bias folded into the add.
    logits = (
        jnp.dot(w2_ref[...], h, preferred_element_type=jnp.float32) + b2_ref[...]
    )

    # ---- Softmax over the action axis (axis 0 here == dim=-1 of the original).
    m = jnp.max(logits, axis=0, keepdims=True)
    e = jnp.exp(logits - m)
    denom = jnp.sum(e, axis=0, keepdims=True)
    o_ref[...] = (e / denom).astype(o_ref.dtype)  # exact normalization


@functools.partial(jax.jit, static_argnames=("max_tile_b",))
def policy_forward(x, w1, b1, w2, b2, *, max_tile_b=32768):
    """Softmax policy probabilities for a batch of states.

    x: [B, 4] f32; weights in PyTorch layout (w1 [H,4], b1 [H], w2 [A,H], b2 [A]).
    Returns [B, A] f32.  The batch rides the 128-lane axis inside the kernel;
    tile size adapts to the (padded) batch, capped at `max_tile_b` columns.
    """
    assert max_tile_b % 128 == 0, "batch tile must be a multiple of the 128-lane axis"
    b, f = x.shape
    h_dim = w1.shape[0]
    a_dim = w2.shape[0]

    # Adaptive tiling: as few, as large tiles as possible (per-step pipeline
    # overhead ~0.35us dominates tiny tiles), but keep >= 2 tiles when the batch
    # allows so the "parallel" grid axis can split across v7x's two TensorCores.
    bp0 = _round_up(b, 128)
    num_tiles = max(1, _cdiv(bp0, max_tile_b))
    if num_tiles == 1 and bp0 >= 256:
        num_tiles = 2
    tile_b = _round_up(_cdiv(bp0, num_tiles), 128)
    bp = num_tiles * tile_b

    # Lane-dense layout: batch on the last (lane) axis; single pad of x.T.
    # (Zero columns give finite bias-only softmax rows; sliced off below.)
    x_t = jnp.pad(x.T.astype(jnp.float32), ((0, 0), (0, bp - b)))

    out_t = pl.pallas_call(
        _policy_mlp_kernel,
        out_shape=jax.ShapeDtypeStruct((a_dim, bp), jnp.float32),
        grid_spec=pltpu.PrefetchScalarGridSpec(
            num_scalar_prefetch=0,
            grid=(num_tiles,),
            in_specs=[
                pl.BlockSpec((f, tile_b), lambda i: (0, i)),      # states: streamed
                pl.BlockSpec((h_dim, f), lambda i: (0, 0)),       # w1: VMEM-resident
                pl.BlockSpec((h_dim, 1), lambda i: (0, 0)),       # b1
                pl.BlockSpec((a_dim, h_dim), lambda i: (0, 0)),   # w2
                pl.BlockSpec((a_dim, 1), lambda i: (0, 0)),       # b2
            ],
            out_specs=pl.BlockSpec((a_dim, tile_b), lambda i: (0, i)),
        ),
        compiler_params=pltpu.CompilerParams(
            # Batch tiles are independent -> dual-TensorCore split on v7x,
            # harmless no-op on v5e/v6e.
            dimension_semantics=("parallel",),
            # Big tiles: above v5e's 16 MiB default scoped limit, under v7x's
            # 64 MiB physical VMEM.
            vmem_limit_bytes=48 * 1024 * 1024,
        ),
    )(x_t, w1, b1.reshape(h_dim, 1), w2, b2.reshape(a_dim, 1))

    return out_t[:, :b].T                                         # back to [B, A]


def init_params(key, in_features=4, hidden=32, actions=4):
    """PyTorch nn.Linear-style U(-1/sqrt(fan_in), 1/sqrt(fan_in)) init, PyTorch layout."""
    k1, k2, k3, k4 = jax.random.split(key, 4)
    bound1 = 1.0 / jnp.sqrt(jnp.float32(in_features))
    bound2 = 1.0 / jnp.sqrt(jnp.float32(hidden))
    w1 = jax.random.uniform(k1, (hidden, in_features), jnp.float32, -bound1, bound1)
    b1 = jax.random.uniform(k2, (hidden,), jnp.float32, -bound1, bound1)
    w2 = jax.random.uniform(k3, (actions, hidden), jnp.float32, -bound2, bound2)
    b2 = jax.random.uniform(k4, (actions,), jnp.float32, -bound2, bound2)
    return w1, b1, w2, b2


if __name__ == "__main__":
    key = jax.random.PRNGKey(0)
    k_x, k_p = jax.random.split(key)

    in_features, hidden, actions = 4, 32, 4   # CartPole-like PolicyNetwork sizes
    w1, b1, w2, b2 = init_params(k_p, in_features, hidden, actions)

    # (batch, max_tile_b): single-tile small batch, a padded two-tile batch, and
    # a tiny-tile case exercising the multi-step parallel grid.
    for batch, max_tile in ((8, 32768), (200, 32768), (300, 128)):
        kx = jax.random.fold_in(k_x, batch)
        x = jax.random.normal(kx, (batch, in_features), dtype=jnp.float32)

        probs = policy_forward(x, w1, b1, w2, b2, max_tile_b=max_tile)
        jax.block_until_ready(probs)

        # Pure-JAX reference (matches the PyTorch nn.Sequential forward).
        h_ref = jnp.maximum(x @ w1.T + b1[None, :], 0.0)
        logits_ref = h_ref @ w2.T + b2[None, :]
        probs_ref = jax.nn.softmax(logits_ref, axis=-1)

        assert probs.shape == (batch, actions)
        assert jnp.allclose(probs, probs_ref, atol=1e-4, rtol=1e-4)
        assert jnp.allclose(jnp.sum(probs, axis=-1), 1.0, atol=1e-4)

    print("KERNEL_OK")
</pallas_src>

<mosaic_0001>
module attributes {stable_mosaic.version = 11 : i64} {
  func.func @_policy_mlp_kernel(%arg0: i32, %arg1: memref<4x128xf32, #tpu.memory_space<vmem>>, %arg2: memref<32x4xf32, #tpu.memory_space<vmem>>, %arg3: memref<32x1xf32, #tpu.memory_space<vmem>>, %arg4: memref<4x32xf32, #tpu.memory_space<vmem>>, %arg5: memref<4x1xf32, #tpu.memory_space<vmem>>, %arg6: memref<4x128xf32, #tpu.memory_space<vmem>>) attributes {dimension_semantics = [#tpu.dimension_semantics<parallel>], iteration_bounds = array<i64: 1>, scalar_prefetch = 0 : i64, scratch_operands = 0 : i64, tpu.core_type = #tpu.core_type<tc>, window_params = [{transform_indices = @transform_0, window_bounds = array<i64: 4, 128>}, {pipeline_mode = #tpu.pipeline_mode<synchronous>, transform_indices = @transform_1, window_bounds = array<i64: 32, 4>}, {pipeline_mode = #tpu.pipeline_mode<synchronous>, transform_indices = @transform_2, window_bounds = array<i64: 32, 1>}, {pipeline_mode = #tpu.pipeline_mode<synchronous>, transform_indices = @transform_3, window_bounds = array<i64: 4, 32>}, {pipeline_mode = #tpu.pipeline_mode<synchronous>, transform_indices = @transform_4, window_bounds = array<i64: 4, 1>}, {transform_indices = @transform_5, window_bounds = array<i64: 4, 128>}]} {
    %c0 = arith.constant 0 : index
    %c0_0 = arith.constant 0 : index
    %0 = vector.load %arg1[%c0, %c0_0] : memref<4x128xf32, #tpu.memory_space<vmem>>, vector<4x128xf32>
    %c0_1 = arith.constant 0 : index
    %c0_2 = arith.constant 0 : index
    %1 = vector.load %arg2[%c0_1, %c0_2] : memref<32x4xf32, #tpu.memory_space<vmem>>, vector<32x4xf32>
    %cst = arith.constant dense<0.000000e+00> : vector<32x128xf32>
    %2 = tpu.matmul %1, %0, %cst {dimension_numbers = #tpu.dot_dimension_numbers<[1], [0], [0], [1], [0, 0, 1, 1], [], []>} : vector<32x4xf32>, vector<4x128xf32>, vector<32x128xf32> -> vector<32x128xf32>
    %c0_3 = arith.constant 0 : index
    %c0_4 = arith.constant 0 : index
    %3 = vector.load %arg3[%c0_3, %c0_4] : memref<32x1xf32, #tpu.memory_space<vmem>>, vector<32x1xf32>
    %4 = vector.broadcast %3 : vector<32x1xf32> to vector<32x128xf32>
    %5 = arith.addf %2, %4 : vector<32x128xf32>
    %cst_5 = arith.constant 0.000000e+00 : f32
    %6 = vector.broadcast %cst_5 : f32 to vector<32x128xf32>
    %7 = arith.maximumf %5, %6 : vector<32x128xf32>
    %c0_6 = arith.constant 0 : index
    %c0_7 = arith.constant 0 : index
    %8 = vector.load %arg4[%c0_6, %c0_7] : memref<4x32xf32, #tpu.memory_space<vmem>>, vector<4x32xf32>
    %cst_8 = arith.constant dense<0.000000e+00> : vector<4x128xf32>
    %9 = tpu.matmul %8, %7, %cst_8 {dimension_numbers = #tpu.dot_dimension_numbers<[1], [0], [0], [1], [0, 0, 1, 1], [], []>} : vector<4x32xf32>, vector<32x128xf32>, vector<4x128xf32> -> vector<4x128xf32>
    %c0_9 = arith.constant 0 : index
    %c0_10 = arith.constant 0 : index
    %10 = vector.load %arg5[%c0_9, %c0_10] : memref<4x1xf32, #tpu.memory_space<vmem>>, vector<4x1xf32>
    %11 = vector.broadcast %10 : vector<4x1xf32> to vector<4x128xf32>
    %12 = arith.addf %9, %11 : vector<4x128xf32>
    %cst_11 = arith.constant dense<0xFF800000> : vector<128xf32>
    %13 = vector.multi_reduction <maximumf>, %12, %cst_11 [0] : vector<4x128xf32> to vector<128xf32>
    %14 = vector.shape_cast %13 : vector<128xf32> to vector<1x128xf32>
    %15 = vector.broadcast %14 : vector<1x128xf32> to vector<4x128xf32>
    %16 = arith.subf %12, %15 : vector<4x128xf32>
    %17 = math.exp %16 : vector<4x128xf32>
    %cst_12 = arith.constant dense<0.000000e+00> : vector<128xf32>
    %18 = vector.multi_reduction <add>, %17, %cst_12 [0] : vector<4x128xf32> to vector<128xf32>
    %19 = vector.shape_cast %18 : vector<128xf32> to vector<1x128xf32>
    %20 = vector.broadcast %19 : vector<1x128xf32> to vector<4x128xf32>
    %21 = arith.divf %17, %20 : vector<4x128xf32>
    %c0_13 = arith.constant 0 : index
    %c0_14 = arith.constant 0 : index
    %22 = vector.load %arg6[%c0_13, %c0_14] : memref<4x128xf32, #tpu.memory_space<vmem>>, vector<4x128xf32>
    tpu.vector_store %arg6[%c0_13, %c0_14], %21 {strides = array<i32>} : memref<4x128xf32, #tpu.memory_space<vmem>>, vector<4x128xf32>,
    return
  }
  func.func @transform_0(%arg0: i32) -> (i32, i32) {
    %c0_i32 = arith.constant 0 : i32
    %c0_i32_0 = arith.constant 0 : i32
    return %c0_i32, %arg0 : i32, i32
  }
  func.func @transform_1(%arg0: i32) -> (i32, i32) {
    %c0_i32 = arith.constant 0 : i32
    %c0_i32_0 = arith.constant 0 : i32
    %c0_i32_1 = arith.constant 0 : i32
    return %c0_i32, %c0_i32_0 : i32, i32
  }
  func.func @transform_2(%arg0: i32) -> (i32, i32) {
    %c0_i32 = arith.constant 0 : i32
    %c0_i32_0 = arith.constant 0 : i32
    %c0_i32_1 = arith.constant 0 : i32
    return %c0_i32, %c0_i32_0 : i32, i32
  }
  func.func @transform_3(%arg0: i32) -> (i32, i32) {
    %c0_i32 = arith.constant 0 : i32
    %c0_i32_0 = arith.constant 0 : i32
    %c0_i32_1 = arith.constant 0 : i32
    return %c0_i32, %c0_i32_0 : i32, i32
  }
  func.func @transform_4(%arg0: i32) -> (i32, i32) {
    %c0_i32 = arith.constant 0 : i32
    %c0_i32_0 = arith.constant 0 : i32
    %c0_i32_1 = arith.constant 0 : i32
    return %c0_i32, %c0_i32_0 : i32, i32
  }
  func.func @transform_5(%arg0: i32) -> (i32, i32) {
    %c0_i32 = arith.constant 0 : i32
    %c0_i32_0 = arith.constant 0 : i32
    return %c0_i32, %arg0 : i32, i32
  }
}

</mosaic_0001>

<bundles_post_ra>
// kernel: policy_forward.1
= control target key start
LH: loop header
LB: loop body
LE: loop exit
PB: predicated region body
PF: predicated region fallthrough
CT: control target
= control target key end

     0   :  { %vm62_vm0 = vcmask 1043456   ;;  %vm49_vm1 = vcmask 31744   ;;  %v311_v3 = vmov 0   ;;  %v312_v11 = vmov 0.0|0.0   ;;  %s389_s0 = inlined_call_operand.vmem [shape: f32[4,128], index: 0, kind: input, shape index: {}]   ;;  %s390_s1 = inlined_call_operand.vmem [shape: f32[32,4], index: 1, kind: input, shape index: {}]   ;;  %s391_s2 = inlined_call_operand.vmem [shape: f32[32,1], index: 2, kind: input, shape index: {}]   ;;  %s392_s4 = inlined_call_operand.vmem [shape: f32[4,1], index: 4, kind: input, shape index: {}]   ;;  %s393_s3 = inlined_call_operand.vmem [shape: f32[4,32], index: 3, kind: input, shape index: {}]   ;;  %s394_s5 = inlined_call_operand.vmem [shape: f32[4,128], index: 5, kind: output, shape index: {}]  }
   0x1   :  { %v20_v0 = vld [vmem:[%s389_s0] sm:$0xf]  ;;  %v22_v2 = vld [vmem:[%s390_s1 + $0x8] sm:$0xff]  ;;  %305 = vset.pattern.permute.xlu0 %v311_v3  ;;  %306 = vset.pattern.permute.xlu1 %v311_v3  ;;  %v23_v4 = vld [vmem:[%s390_s1 + $0x10] sm:$0xff]  ;;  %vm313_vm2 = vmmov 0   ;;  %v314_v12 = vmov 0.0  }
   0x2   :  { %v21_v1 = vld [vmem:[%s390_s1] sm:$0xff]  ;;  %276 = vmatprep.subr.msk.mxu0 %vm62_vm0, %v20_v0  ;;  %v27_v6 = vld [vmem:[%s391_s2 + $0x10] sm:$0xff]  ;;  %v26_v7 = vld [vmem:[%s391_s2 + $0x8] sm:$0xff]  ;;  %295 = vmatprep.subr.bf16.mxu1 %v312_v11  ;;  %vm162_vm3 = vcmask 261120  }
   0x3   :  { %278 = vmatprep.mubr.msk.f32.mxu0 %vm49_vm1, %v21_v1  ;;  %v25_v5 = vld [vmem:[%s391_s2] sm:$0xff]  ;;  %277 = vmatpush3.msk.msra.mxu0 %vm62_vm0, %v20_v0  ;;  %v24_v8 = vld [vmem:[%s390_s1 + $0x18] sm:$0xff] }
   0x4   :  { %31 = vperm.xlu0 %305, %v25_v5   ;;  %279 = vmatmul.mubr.msk.f32.vlgmr.msra.gmra.mrb[0].mxu0 %vm49_vm1, %v22_v2  ;;  %v28_v9 = vld [vmem:[%s391_s2 + $0x18] sm:$0xff]  ;;  %v156_v10 = vld [vmem:[%s392_s4] sm:$0xf] }
   0x5   :  { %41 = vperm.xlu1 %306, %v27_v6   ;;  %281 = vmatprep.mubr.msk.f32.mxu0 %vm49_vm1, %v23_v4  ;;  %v155_v31 = vld [vmem:[%s393_s3] sm:$0xf] }
   0x6   :  { %292 = vmatprep.mubr.msk.f32.mxu1 %vm313_vm2, %v314_v12 }
   0x8   :  { %36 = vperm.xlu0 %305, %v26_v7   ;;  %282 = vmatmul.mubr.msk.f32.gmra.mrb[2].mxu0 %vm49_vm1, %v24_v8 }
   0x9   :  { %46 = vperm.xlu1 %306, %v28_v9  }
   0xc   :  { %159 = vperm.xlu0 %305, %v156_v10  }
  0x83   :  { %v32_v13 = vpop.permute.xlu0 %31 }
  0x84   :  { %v42_v14 = vpop.permute.xlu1 %41 }
  0x87   :  { %v37_v15 = vpop.permute.xlu0 %36 }
  0x88   :  { %v47_v21 = vpop.permute.xlu1 %46 }
  0x8b   :  { %v160_v32 = vpop.permute.xlu0 %159 }
  0xd7   :  { %v280_v16 = vpop.f32.mrb[0].mxu0 }
  0xd8   :  { %v138_v17 = vadd.f32 %v280_v16, %v37_v15  ;;  %v132_v18 = vpop.f32.mrb[1].mxu0 }
  0xd9   :  { %v133_v19 = vadd.f32 %v132_v18, %v32_v13 }
  0xda   :  { %v152_v20 = vmax.f32 %v138_v17, 0.0 }
  0xdb   :  { %v151_v22 = vmax.f32 %v133_v19, 0.0  ;;  %v283_v23 = vpop.f32.mrb[2].mxu0 }
  0xdc   :  { %v148_v24 = vadd.f32 %v283_v23, %v47_v21  ;;  %v142_v25 = vpop.f32.mrb[3].mxu0 }
  0xdd   :  { %v143_v26 = vadd.f32 %v142_v25, %v42_v14  ;;  %v296_v27 = vpack.c.bf16 %v152_v20, %v151_v22 }
  0xde   :  { %v154_v28 = vmax.f32 %v148_v24, 0.0 }
  0xdf   :  { %v153_v29 = vmax.f32 %v143_v26, 0.0  ;;  %297 = vmatpush3.bf16.msra.mxu1 %v296_v27 }
  0xe0   :  { %298 = vmatprep.subr.bf16.mxu1 %v312_v11 }
  0xe1   :  { %v299_v30 = vpack.c.bf16 %v154_v28, %v153_v29 }
  0xe3   :  { %300 = vmatpush3.bf16.msra.mxu1 %v299_v30 }
  0xe6   :  { %293 = vmatmul.mubr.msk.f32.vlgmr.msra.gmra.mrb[0].mxu1 %vm162_vm3, %v155_v31 }
 0x1b9   :  { %v232_v33 = vpop.f32.mrb[0].mxu1 }
 0x1ba   :  { %v233_v34 = vadd.f32 %v232_v33, %v160_v32  ;;  %v294_v35 = vpop.f32.mrb[1].mxu1 }
 0x1bc   :  { %v236_v36 = vsel %vm62_vm0, %v233_v34, -inf }
 0x1bd   :  { %v237_v37 = vrot.slane %v236_v36, 4 }
 0x1bf   :  { %v238_v38 = vmax.f32 %v236_v36, %v237_v37 }
 0x1c1   :  { %v239_v39 = vrot.slane %v238_v38, 2 }
 0x1c3   :  { %v240_v40 = vmax.f32 %v238_v38, %v239_v39 }
 0x1c5   :  { %v241_v41 = vrot.slane %v240_v40, 1 }
 0x1c7   :  { %v242_v42 = vmax.f32 %v240_v40, %v241_v41 }
 0x1c9   :  { %v243_v43 = vsub.f32 %v233_v34, %v242_v42 }
 0x1cb   :  { %v244_v44 = vmul.f32 1.442695, %v243_v43 }
 0x1cd   :  { %307 = vpow2.f32 %v244_v44 }
 0x1d7   :  { %v308_v45 = vpop.eup %307 }
 0x1d8   :  { %v246_v46 = vsel %vm62_vm0, %v308_v45, 0.0 }
 0x1d9   :  { %v247_v47 = vrot.slane %v246_v46, 4 }
 0x1db   :  { %v248_v48 = vadd.f32 %v247_v47, %v246_v46 }
 0x1dd   :  { %v249_v49 = vrot.slane %v248_v48, 2 }
 0x1df   :  { %v250_v50 = vadd.f32 %v249_v49, %v248_v48 }
 0x1e1   :  { %v251_v51 = vrot.slane %v250_v50, 1 }
 0x1e3   :  { %v252_v52 = vadd.f32 %v251_v51, %v250_v50 }
 0x1e5   :  { %309 = vrcp.f32 %v252_v52 }
 0x1ef   :  { %v310_v53 = vpop.eup %309 }
 0x1f0   :  { %v254_v54 = vmul.f32 %v310_v53, %v308_v45 }
 0x1f2   :  { %255 = vst [vmem:[%s394_s5] sm:$0xf] %v254_v54 }

</bundles_post_ra>
